<compile_context>
chip_gen: v6e
topology: v6e:2x2x1
jax: 0.10.0
libtpu: 0.0.40
codegen_flags: <defaults>
</compile_context>

<pallas_src>
import functools

import jax
import jax.numpy as jnp
from jax.experimental import pallas as pl
from jax.experimental.pallas import tpu as pltpu

# ----- model dimensions (from the PyTorch module) ---------------------------
C_FEAT = 512                      # backbone feature channels (global pooled)
RF_DIM = 100                      # rf_pool hidden dim
RF_PAD = 128                      # rf padded to one lane group
IN_FEAT = C_FEAT + RF_DIM         # 612  (classifier[1].in_features)
IN_PAD = C_FEAT + RF_PAD          # 640  (lane-dense combined feature)
HIDDEN = 512                      # hidden_layer first Linear
OUT_HIDDEN = 32                   # hidden_layer second Linear
AUX_TASKS = (("age", 1), ("birads", 7), ("density", 4))
AUX_TOTAL = sum(k for _, k in AUX_TASKS)          # 12
NUM_CLASSES = 2
FINAL_IN = OUT_HIDDEN + AUX_TOTAL                 # 44
FINAL_PAD = 64                                    # padded enhanced feature
H1_FUSED = HIDDEN + 3 * 256                       # 1280 fused first layer
OUT_PACK = 128                                    # lane-dense packed output

# packed-output column layout: [main(2) | age(1) | birads(7) | density(4) | 0]
PK_AGE = NUM_CLASSES                              # 2
PK_BIR = PK_AGE + 1                               # 3
PK_DEN = PK_BIR + 7                               # 10
PK_END = PK_DEN + 4                               # 14

MAX_TILE_HW = 1024                # spatial rows per encoder grid step
HEAD_TB = 8                       # batch tile (one sublane group)


def _round_up(x, m):
    return (x + m - 1) // m * m


# ============================================================================
# Kernel A: synthetic encoder (per-pixel linear + ReLU) + global average pool
#           + rf_pool stand-in (tanh projection), tiled over the spatial axis.
#           Emits one lane-dense (1, 640) combined row per image.
# ============================================================================
def _encoder_pool_kernel(x_ref, w_eff_ref, b_enc_ref, w_rf_ref, b_rf_ref,
                         comb_ref, acc_ref, *, hw, tile, inv_hw, needs_mask):
    t = pl.program_id(1)

    @pl.when(t == 0)
    def _init():
        acc_ref[...] = jnp.zeros_like(acc_ref)

    x = x_ref[0]                                                    # (tile, 1) f32
    # VPU broadcast-FMA: pixel scalar (sublanes) x channel weights (lanes).
    feat = jnp.maximum(x * w_eff_ref[...] + b_enc_ref[...], 0.0)    # (tile, C_FEAT)
    if needs_mask:
        offs = t * tile + jax.lax.broadcasted_iota(jnp.int32, (tile, 1), 0)
        feat = jnp.where(offs < hw, feat, 0.0)                      # zero padded pixels
    acc_ref[...] += jnp.sum(feat, axis=0, keepdims=True)            # (1, C_FEAT)

    @pl.when(t == pl.num_programs(1) - 1)
    def _finalize():
        pooled = acc_ref[...] * inv_hw                              # mean = sum * 1/HW
        rf = jnp.tanh(
            jnp.dot(pooled.astype(jnp.bfloat16), w_rf_ref[...],
                    preferred_element_type=jnp.float32) + b_rf_ref[...])  # (1, RF_PAD)
        comb_ref[0, :, 0:RF_PAD] = rf                               # rf (padded cols = 0)
        comb_ref[0, :, RF_PAD:IN_PAD] = pooled                      # pooled feature


def encoder_pool(x_flat, w_eff, b_enc, w_rf_pad, b_rf_pad):
    """x_flat: (B, HW) f32 single-channel image. Returns (B, IN_PAD) combined."""
    B, hw = x_flat.shape
    tile = min(MAX_TILE_HW, _round_up(hw, 8))
    n_t = pl.cdiv(hw, tile)
    hw_pad = n_t * tile
    if hw_pad != hw:
        x_flat = jnp.pad(x_flat, ((0, 0), (0, hw_pad - hw)))
    x = x_flat.reshape(B, hw_pad, 1)

    kernel = functools.partial(
        _encoder_pool_kernel, hw=hw, tile=tile, inv_hw=1.0 / hw,
        needs_mask=(hw_pad != hw))

    # explicit VMEM budget: 2x (lane-padded) input tile + intermediates + weights
    vmem_bytes = (2 * (tile // 8) * 8 * 128 * 4            # double-buffered x tile
                  + 4 * tile * C_FEAT * 4                  # feat + temporaries
                  + 2 * C_FEAT * RF_PAD * 2                # rf weight
                  + (2 << 20))                             # slack
    vmem_limit = int(min(48 * 2**20, max(8 * 2**20, vmem_bytes)))

    comb = pl.pallas_call(
        kernel,
        out_shape=jax.ShapeDtypeStruct((B, 1, IN_PAD), jnp.float32),
        grid=(B, n_t),
        in_specs=[
            pl.BlockSpec((1, tile, 1), lambda b, t: (b, t, 0)),
            pl.BlockSpec((1, C_FEAT), lambda b, t: (0, 0)),
            pl.BlockSpec((1, C_FEAT), lambda b, t: (0, 0)),
            pl.BlockSpec((C_FEAT, RF_PAD), lambda b, t: (0, 0)),
            pl.BlockSpec((1, RF_PAD), lambda b, t: (0, 0)),
        ],
        out_specs=pl.BlockSpec((1, 1, IN_PAD), lambda b, t: (b, 0, 0)),
        scratch_shapes=[pltpu.VMEM((1, C_FEAT), jnp.float32)],
        compiler_params=pltpu.CompilerParams(
            dimension_semantics=("parallel", "arbitrary"),
            vmem_limit_bytes=vmem_limit),
    )(x, w_eff, b_enc, w_rf_pad, b_rf_pad)
    return comb.reshape(B, IN_PAD)


# ============================================================================
# Kernel B: fused head stack.
#   One (640, 1280) bf16 matmul for all first layers, one block-diagonal
#   (1280, 64) bf16 matmul for all second layers, sigmoid/softmax, one padded
#   (64, 128) bf16 classifier matmul, packed lane-dense (B, 128) output.
# ============================================================================
def _softmax(z):
    z = z - jnp.max(z, axis=-1, keepdims=True)
    e = jnp.exp(z)
    return e / jnp.sum(e, axis=-1, keepdims=True)


def _mlp_head_kernel(comb_ref, w1_ref, b1_ref, w2_ref, b2_ref, wc_ref, bc_ref,
                     out_ref):
    c = comb_ref[...].astype(jnp.bfloat16)                            # (TB, 640)
    h = jnp.dot(c, w1_ref[...], preferred_element_type=jnp.float32) + b1_ref[...]
    h = jnp.maximum(h, 0.0).astype(jnp.bfloat16)                      # (TB, 1280)
    z = jnp.dot(h, w2_ref[...], preferred_element_type=jnp.float32) + b2_ref[...]

    hidden = z[:, 0:OUT_HIDDEN]                                       # (TB, 32)
    age = jax.nn.sigmoid(z[:, 32:33])                                 # (TB, 1)
    birads = _softmax(z[:, 33:40])                                    # (TB, 7)
    density = _softmax(z[:, 40:44])                                   # (TB, 4)

    tb = z.shape[0]
    enh = jnp.concatenate(
        [hidden, age, birads, density,
         jnp.zeros((tb, FINAL_PAD - FINAL_IN), jnp.float32)], axis=-1)  # (TB, 64)
    main = jnp.dot(enh.astype(jnp.bfloat16), wc_ref[...],
                   preferred_element_type=jnp.float32) + bc_ref[...]    # (TB, 128)

    out_ref[...] = jnp.concatenate(
        [main[:, 0:NUM_CLASSES], age, birads, density,
         jnp.zeros((tb, OUT_PACK - PK_END), jnp.float32)], axis=-1)


def mlp_heads(combined, hp):
    """combined: (B, IN_PAD) f32.  Returns packed (B, OUT_PACK) f32."""
    B = combined.shape[0]
    b_pad = _round_up(max(B, HEAD_TB), HEAD_TB)
    if b_pad != B:
        combined = jnp.pad(combined, ((0, b_pad - B), (0, 0)))
    n_b = b_pad // HEAD_TB

    packed = pl.pallas_call(
        _mlp_head_kernel,
        out_shape=jax.ShapeDtypeStruct((b_pad, OUT_PACK), jnp.float32),
        grid=(n_b,),
        in_specs=[
            pl.BlockSpec((HEAD_TB, IN_PAD), lambda i: (i, 0)),
            pl.BlockSpec((IN_PAD, H1_FUSED), lambda i: (0, 0)),
            pl.BlockSpec((1, H1_FUSED), lambda i: (0, 0)),
            pl.BlockSpec((H1_FUSED, FINAL_PAD), lambda i: (0, 0)),
            pl.BlockSpec((1, FINAL_PAD), lambda i: (0, 0)),
            pl.BlockSpec((FINAL_PAD, OUT_PACK), lambda i: (0, 0)),
            pl.BlockSpec((1, OUT_PACK), lambda i: (0, 0)),
        ],
        out_specs=pl.BlockSpec((HEAD_TB, OUT_PACK), lambda i: (i, 0)),
        compiler_params=pltpu.CompilerParams(
            dimension_semantics=("parallel",),
            vmem_limit_bytes=32 * 2**20),
    )(combined, hp["W1"], hp["b1"], hp["W2"], hp["b2"], hp["WC"], hp["BC"])
    return packed[:B]


# ============================================================================
# Parameter init (deterministic, PyTorch-Linear-like uniform fan-in init)
# and fused/padded/bf16 weight preparation (one-time, outside kernels).
# ============================================================================
def _linear_params(key, fan_in, fan_out):
    kw, kb = jax.random.split(key)
    bound = 1.0 / (fan_in ** 0.5)
    w = jax.random.uniform(kw, (fan_in, fan_out), jnp.float32, -bound, bound)
    b = jax.random.uniform(kb, (1, fan_out), jnp.float32, -bound, bound)
    return w, b


def init_params(key):
    keys = jax.random.split(key, 9)
    p = {}
    # synthetic backbone (per-pixel linear 3 -> 512, the 3 input channels are
    # the repeated single channel) + rf projection
    p["w_enc"], p["b_enc"] = _linear_params(keys[0], 3, C_FEAT)
    p["w_rf"], p["b_rf"] = _linear_params(keys[1], C_FEAT, RF_DIM)
    # hidden_layer: Linear(612, 512) -> ReLU -> Linear(512, 32)
    p["wh1"], p["bh1"] = _linear_params(keys[2], IN_FEAT, HIDDEN)
    p["wh2"], p["bh2"] = _linear_params(keys[3], HIDDEN, OUT_HIDDEN)
    # aux heads: Linear(612, 256) -> ReLU -> Linear(256, k)
    p["wa1"], p["ba1"] = _linear_params(keys[4], IN_FEAT, 256)
    p["wa2"], p["ba2"] = _linear_params(keys[5], 256, 1)
    p["wb1"], p["bb1"] = _linear_params(keys[6], IN_FEAT, 256)
    p["wb2"], p["bb2"] = _linear_params(keys[7], 256, 7)
    kd1, kd2, kc = jax.random.split(keys[8], 3)
    p["wd1"], p["bd1"] = _linear_params(kd1, IN_FEAT, 256)
    p["wd2"], p["bd2"] = _linear_params(kd2, 256, 4)
    # final classifier: Linear(32 + 12, num_classes)
    p["wc"], p["bc"] = _linear_params(kc, FINAL_IN, NUM_CLASSES)
    return p


def prepare_params(p):
    f32, bf16 = jnp.float32, jnp.bfloat16
    # encoder: fold the 1->3 channel repeat into the weights (exact: input has
    # a single channel repeated 3x, guarded by the C==1 assert in the wrapper)
    w_eff = jnp.sum(p["w_enc"], axis=0, keepdims=True).astype(f32)       # (1, 512)
    w_rf = jnp.zeros((C_FEAT, RF_PAD), f32).at[:, :RF_DIM].set(p["w_rf"]).astype(bf16)
    b_rf = jnp.zeros((1, RF_PAD), f32).at[:, :RF_DIM].set(p["b_rf"])

    # fused first layers [hidden | age | birads | density]; combined-feature
    # rows re-indexed for the padded layout [rf 0:100 | pad 100:128 | pooled 128:640]
    w1_cat = jnp.concatenate([p["wh1"], p["wa1"], p["wb1"], p["wd1"]], axis=1)  # (612, 1280)
    W1 = jnp.zeros((IN_PAD, H1_FUSED), f32)
    W1 = W1.at[0:RF_DIM, :].set(w1_cat[0:RF_DIM, :])
    W1 = W1.at[RF_PAD:IN_PAD, :].set(w1_cat[RF_DIM:IN_FEAT, :])
    W1 = W1.astype(bf16)
    b1 = jnp.concatenate([p["bh1"], p["ba1"], p["bb1"], p["bd1"]], axis=1)      # (1, 1280)

    # block-diagonal fused second layers -> 64-wide padded logits
    # cols: [hidden 0:32 | age 32:33 | birads 33:40 | density 40:44 | 0]
    W2 = jnp.zeros((H1_FUSED, FINAL_PAD), f32)
    W2 = W2.at[0:HIDDEN, 0:OUT_HIDDEN].set(p["wh2"])
    W2 = W2.at[HIDDEN:HIDDEN + 256, 32:33].set(p["wa2"])
    W2 = W2.at[HIDDEN + 256:HIDDEN + 512, 33:40].set(p["wb2"])
    W2 = W2.at[HIDDEN + 512:HIDDEN + 768, 40:44].set(p["wd2"])
    W2 = W2.astype(bf16)
    b2 = jnp.zeros((1, FINAL_PAD), f32)
    b2 = b2.at[:, 0:OUT_HIDDEN].set(p["bh2"])
    b2 = b2.at[:, 32:33].set(p["ba2"])
    b2 = b2.at[:, 33:40].set(p["bb2"])
    b2 = b2.at[:, 40:44].set(p["bd2"])

    # final classifier over the activated enhanced feature, zero-padded
    WC = (jnp.zeros((FINAL_PAD, OUT_PACK), f32)
          .at[0:FINAL_IN, 0:NUM_CLASSES].set(p["wc"]).astype(bf16))
    BC = jnp.zeros((1, OUT_PACK), f32).at[:, 0:NUM_CLASSES].set(p["bc"])

    return {"w_eff": w_eff, "b_enc": p["b_enc"], "w_rf": w_rf, "b_rf": b_rf,
            "W1": W1, "b1": b1, "W2": W2, "b2": b2, "WC": WC, "BC": BC}


# ============================================================================
# Forward (glue in plain JAX, hot paths in the two Pallas kernels)
# ============================================================================
def multitask_mirai_forward(images, prepared):
    assert images.ndim == 4, f"Input must be 4D tensor, got {images.shape}"
    B, C, H, W = images.shape
    assert C == 1, f"Expected single channel input, got {C} channels"
    # The PyTorch 1->3 channel repeat is folded into w_eff (exact for C == 1);
    # [B,1,H,W] -> [B, H*W] is a free reshape, no transpose / no 3x HBM blowup.
    x_flat = images.reshape(B, H * W).astype(jnp.float32)

    combined = encoder_pool(x_flat, prepared["w_eff"], prepared["b_enc"],
                            prepared["w_rf"], prepared["b_rf"])   # (B, 640)
    packed = mlp_heads(combined, prepared)                        # (B, 128)

    main = packed[:, 0:NUM_CLASSES]
    age = packed[:, PK_AGE:PK_BIR]
    birads = packed[:, PK_BIR:PK_DEN]
    density = packed[:, PK_DEN:PK_END]
    return {"predict": main,
            "age": age,
            "birads": birads,
            "density": density,
            "losses": {},
            "loss": None}


if __name__ == "__main__":
    key = jax.random.PRNGKey(0)
    k_img, k_params = jax.random.split(key)

    B, H, W = 2, 16, 16
    images = jax.random.normal(k_img, (B, 1, H, W), jnp.float32)
    params = init_params(k_params)
    prepared = prepare_params(params)

    out = multitask_mirai_forward(images, prepared)
    jax.block_until_ready(out["predict"])

    assert out["predict"].shape == (B, NUM_CLASSES)
    assert out["age"].shape == (B, 1)
    assert out["birads"].shape == (B, 7)
    assert out["density"].shape == (B, 4)
    # sigmoid / softmax sanity
    assert bool(jnp.all((out["age"] >= 0) & (out["age"] <= 1)))
    assert bool(jnp.allclose(jnp.sum(out["birads"], axis=-1), 1.0, atol=1e-5))
    assert bool(jnp.allclose(jnp.sum(out["density"], axis=-1), 1.0, atol=1e-5))

    print("KERNEL_OK")
</pallas_src>

<mosaic_0001>
module attributes {stable_mosaic.version = 11 : i64} {
  func.func @_encoder_pool_kernel(%arg0: i32, %arg1: i32, %arg2: memref<1x256x1xf32, #tpu.memory_space<vmem>>, %arg3: memref<1x512xf32, #tpu.memory_space<vmem>>, %arg4: memref<1x512xf32, #tpu.memory_space<vmem>>, %arg5: memref<512x128xbf16, #tpu.memory_space<vmem>>, %arg6: memref<1x128xf32, #tpu.memory_space<vmem>>, %arg7: memref<1x1x640xf32, #tpu.memory_space<vmem>>, %arg8: memref<1x512xf32, #tpu.memory_space<vmem>>) attributes {dimension_semantics = [#tpu.dimension_semantics<parallel>, #tpu.dimension_semantics<arbitrary>], iteration_bounds = array<i64: 2, 1>, scalar_prefetch = 0 : i64, scratch_operands = 1 : i64, tpu.core_type = #tpu.core_type<tc>, window_params = [{transform_indices = @transform_0, window_bounds = array<i64: 1, 256, 1>}, {pipeline_mode = #tpu.pipeline_mode<synchronous>, transform_indices = @transform_1, window_bounds = array<i64: 1, 512>}, {pipeline_mode = #tpu.pipeline_mode<synchronous>, transform_indices = @transform_2, window_bounds = array<i64: 1, 512>}, {pipeline_mode = #tpu.pipeline_mode<synchronous>, transform_indices = @transform_3, window_bounds = array<i64: 512, 128>}, {pipeline_mode = #tpu.pipeline_mode<synchronous>, transform_indices = @transform_4, window_bounds = array<i64: 1, 128>}, {transform_indices = @transform_5, window_bounds = array<i64: 1, 1, 640>}]} {
    %c0_i32 = arith.constant 0 : i32
    %0 = arith.cmpi eq, %arg1, %c0_i32 : i32
    %1 = arith.extui %0 : i1 to i32
    %c0_i32_0 = arith.constant 0 : i32
    %2 = arith.cmpi ne, %1, %c0_i32_0 : i32
    scf.if %2 {
      %cst_14 = arith.constant 0.000000e+00 : f32
      %22 = vector.broadcast %cst_14 : f32 to vector<1x512xf32>
      %c0_15 = arith.constant 0 : index
      %c0_16 = arith.constant 0 : index
      %23 = vector.load %arg8[%c0_15, %c0_16] : memref<1x512xf32, #tpu.memory_space<vmem>>, vector<1x512xf32>
      tpu.vector_store %arg8[%c0_15, %c0_16], %22 {strides = array<i32>} : memref<1x512xf32, #tpu.memory_space<vmem>>, vector<1x512xf32>,
    } else {
    }
    %c0 = arith.constant 0 : index
    %c0_1 = arith.constant 0 : index
    %c0_2 = arith.constant 0 : index
    %3 = vector.load %arg2[%c0, %c0_1, %c0_2] : memref<1x256x1xf32, #tpu.memory_space<vmem>>, vector<1x256x1xf32>
    %4 = vector.shape_cast %3 : vector<1x256x1xf32> to vector<256x1xf32>
    %c0_3 = arith.constant 0 : index
    %c0_4 = arith.constant 0 : index
    %5 = vector.load %arg3[%c0_3, %c0_4] : memref<1x512xf32, #tpu.memory_space<vmem>>, vector<1x512xf32>
    %6 = vector.broadcast %4 : vector<256x1xf32> to vector<256x512xf32>
    %7 = vector.broadcast %5 : vector<1x512xf32> to vector<256x512xf32>
    %8 = arith.mulf %6, %7 : vector<256x512xf32>
    %c0_5 = arith.constant 0 : index
    %c0_6 = arith.constant 0 : index
    %9 = vector.load %arg4[%c0_5, %c0_6] : memref<1x512xf32, #tpu.memory_space<vmem>>, vector<1x512xf32>
    %10 = vector.broadcast %9 : vector<1x512xf32> to vector<256x512xf32>
    %11 = arith.addf %8, %10 : vector<256x512xf32>
    %cst = arith.constant 0.000000e+00 : f32
    %12 = vector.broadcast %cst : f32 to vector<256x512xf32>
    %13 = arith.maximumf %11, %12 : vector<256x512xf32>
    %c0_7 = arith.constant 0 : index
    %c0_8 = arith.constant 0 : index
    %14 = vector.load %arg8[%c0_7, %c0_8] : memref<1x512xf32, #tpu.memory_space<vmem>>, vector<1x512xf32>
    %cst_9 = arith.constant dense<0.000000e+00> : vector<512xf32>
    %15 = vector.multi_reduction <add>, %13, %cst_9 [0] : vector<256x512xf32> to vector<512xf32>
    %16 = vector.shape_cast %15 : vector<512xf32> to vector<1x512xf32>
    %17 = arith.addf %14, %16 : vector<1x512xf32>
    %c0_10 = arith.constant 0 : index
    %c0_11 = arith.constant 0 : index
    %18 = vector.load %arg8[%c0_10, %c0_11] : memref<1x512xf32, #tpu.memory_space<vmem>>, vector<1x512xf32>
    tpu.vector_store %arg8[%c0_10, %c0_11], %17 {strides = array<i32>} : memref<1x512xf32, #tpu.memory_space<vmem>>, vector<1x512xf32>,
    %c0_i32_12 = arith.constant 0 : i32
    %19 = arith.cmpi eq, %arg1, %c0_i32_12 : i32
    %20 = arith.extui %19 : i1 to i32
    %c0_i32_13 = arith.constant 0 : i32
    %21 = arith.cmpi ne, %20, %c0_i32_13 : i32
    scf.if %21 {
      %c0_14 = arith.constant 0 : index
      %c0_15 = arith.constant 0 : index
      %22 = vector.load %arg8[%c0_14, %c0_15] : memref<1x512xf32, #tpu.memory_space<vmem>>, vector<1x512xf32>
      %cst_16 = arith.constant 3.906250e-03 : f32
      %23 = vector.broadcast %cst_16 : f32 to vector<1x512xf32>
      %24 = arith.mulf %22, %23 : vector<1x512xf32>
      %25 = arith.truncf %24 : vector<1x512xf32> to vector<1x512xbf16>
      %c0_17 = arith.constant 0 : index
      %c0_18 = arith.constant 0 : index
      %26 = vector.load %arg5[%c0_17, %c0_18] : memref<512x128xbf16, #tpu.memory_space<vmem>>, vector<512x128xbf16>
      %cst_19 = arith.constant dense<0.000000e+00> : vector<1x128xf32>
      %27 = tpu.matmul %25, %26, %cst_19 {dimension_numbers = #tpu.dot_dimension_numbers<[1], [0], [0], [1], [0, 0, 1, 1], [], []>} : vector<1x512xbf16>, vector<512x128xbf16>, vector<1x128xf32> -> vector<1x128xf32>
      %c0_20 = arith.constant 0 : index
      %c0_21 = arith.constant 0 : index
      %28 = vector.load %arg6[%c0_20, %c0_21] : memref<1x128xf32, #tpu.memory_space<vmem>>, vector<1x128xf32>
      %29 = arith.addf %27, %28 : vector<1x128xf32>
      %30 = math.tanh %29 : vector<1x128xf32>
      %c0_22 = arith.constant 0 : index
      %c0_23 = arith.constant 0 : index
      %c0_24 = arith.constant 0 : index
      %31 = vector.load %arg7[%c0_22, %c0_23, %c0_24] : memref<1x1x640xf32, #tpu.memory_space<vmem>>, vector<1x1x128xf32>
      %32 = vector.shape_cast %31 : vector<1x1x128xf32> to vector<1x128xf32>
      %33 = vector.shape_cast %30 : vector<1x128xf32> to vector<1x1x128xf32>
      tpu.vector_store %arg7[%c0_22, %c0_23, %c0_24], %33 {strides = array<i32>} : memref<1x1x640xf32, #tpu.memory_space<vmem>>, vector<1x1x128xf32>,
      %c0_25 = arith.constant 0 : index
      %c0_26 = arith.constant 0 : index
      %c128 = arith.constant 128 : index
      %34 = vector.load %arg7[%c0_25, %c0_26, %c128] : memref<1x1x640xf32, #tpu.memory_space<vmem>>, vector<1x1x512xf32>
      %35 = vector.shape_cast %34 : vector<1x1x512xf32> to vector<1x512xf32>
      %36 = vector.shape_cast %24 : vector<1x512xf32> to vector<1x1x512xf32>
      tpu.vector_store %arg7[%c0_25, %c0_26, %c128], %36 {strides = array<i32>} : memref<1x1x640xf32, #tpu.memory_space<vmem>>, vector<1x1x512xf32>,
    } else {
    }
    return
  }
  func.func @transform_0(%arg0: i32, %arg1: i32) -> (i32, i32, i32) {
    %c0_i32 = arith.constant 0 : i32
    %c0_i32_0 = arith.constant 0 : i32
    return %arg0, %arg1, %c0_i32 : i32, i32, i32
  }
  func.func @transform_1(%arg0: i32, %arg1: i32) -> (i32, i32) {
    %c0_i32 = arith.constant 0 : i32
    %c0_i32_0 = arith.constant 0 : i32
    %c0_i32_1 = arith.constant 0 : i32
    return %c0_i32, %c0_i32_0 : i32, i32
  }
  func.func @transform_2(%arg0: i32, %arg1: i32) -> (i32, i32) {
    %c0_i32 = arith.constant 0 : i32
    %c0_i32_0 = arith.constant 0 : i32
    %c0_i32_1 = arith.constant 0 : i32
    return %c0_i32, %c0_i32_0 : i32, i32
  }
  func.func @transform_3(%arg0: i32, %arg1: i32) -> (i32, i32) {
    %c0_i32 = arith.constant 0 : i32
    %c0_i32_0 = arith.constant 0 : i32
    %c0_i32_1 = arith.constant 0 : i32
    return %c0_i32, %c0_i32_0 : i32, i32
  }
  func.func @transform_4(%arg0: i32, %arg1: i32) -> (i32, i32) {
    %c0_i32 = arith.constant 0 : i32
    %c0_i32_0 = arith.constant 0 : i32
    %c0_i32_1 = arith.constant 0 : i32
    return %c0_i32, %c0_i32_0 : i32, i32
  }
  func.func @transform_5(%arg0: i32, %arg1: i32) -> (i32, i32, i32) {
    %c0_i32 = arith.constant 0 : i32
    %c0_i32_0 = arith.constant 0 : i32
    %c0_i32_1 = arith.constant 0 : i32
    return %arg0, %c0_i32, %c0_i32_0 : i32, i32, i32
  }
}

</mosaic_0001>

<bundles_post_ra>
// kernel: tpu_custom_call.1
= control target key start
LH: loop header
LB: loop body
LE: loop exit
PB: predicated region body
PF: predicated region fallthrough
CT: control target
= control target key end

     0   :  { %10 = vsyncpa [#allocation4], 0  ;;  %s2416_s0 = inlined_call_operand.vmem [shape: f32[2,256,1], index: 0, kind: input, shape index: {}]   ;;  %s2417_s1 = inlined_call_operand.vmem [shape: f32[1,512], index: 1, kind: input, shape index: {}]   ;;  %s2418_s2 = inlined_call_operand.vmem [shape: f32[1,512], index: 2, kind: input, shape index: {}]   ;;  %s2419_s3 = inlined_call_operand.vmem [shape: bf16[512,128], index: 3, kind: input, shape index: {}]   ;;  %s2420_s4 = inlined_call_operand.vmem [shape: f32[1,128], index: 4, kind: input, shape index: {}]   ;;  %s2421_s5 = inlined_call_operand.hbm [shape: f32[2,1,640], index: 5, kind: output, shape index: {}]  }
   0x1   :  { %12 = vsyncpa [#allocation4 + $0x1], 0  ;;  %s1820_s18 = smov 0   ;;  %s1822_s19 = smov 0  }
   0x2   :  { %s1824_s20 = smov 0   ;;  %s1826_s21 = smov 0  }
   0x3   :  { %s1828_s22 = smov 0   ;;  %s1830_s23 = smov 0  }
   0x4 LB: > { %s1525_s24 = sadd.s32 4294967295, %s1784_s23   ;;  %s1526_s25 = sadd.s32 4294967294, %s1784_s23   ;;  %s1784_s23 = sphi %s1830_s23, %s18_s23   ;;  %s1780_s22 = sphi %s1828_s22, %s2430_s22   ;;  %s1776_s21 = sphi %s1826_s21, %s2429_s21   ;;  %s1772_s20 = sphi %s1824_s20, %s2428_s20   ;;  %s1768_s19 = sphi %s1822_s19, %s2427_s19   ;;  %s1764_s18 = sphi %s1820_s18, %s2426_s18  }
   0x5   : > { %s30_s26 = sadd.s32 1, %s1780_s22  ;;  %s149_s27 = sadd.s32 1, %s1772_s20 }
   0x6   : > { %p32_p0 = scmp.ge.s32.totalorder %s30_s26, 2  ;;  %p159_p1 = scmp.ne.s32.totalorder %s1772_s20, %s1768_s19 }
   0x7   : > { %p160_p2 = scmp.eq.s32.totalorder %s1525_s24, 1  ;;  %p165_p3 = scmp.ne.s32.totalorder %s1768_s19, %s1764_s18 }
   0x8   : > { %s2432_s26 = smov (%p32_p0, %s30_s26), 0  ;;  %p166_p5 = scmp.eq.s32.totalorder %s1526_s25, 1 }
   0x9   : > { %p1860_p4 = por %p160_p2, %p159_p1  ;;  %s146_s29 = ssub.s32 %s1780_s22, %s2432_s26 }
   0xa   : > { %p1529_p6 = scmp.ge.s32.totalorder %s1784_s23, 1  ;;  %p147_p7 = scmp.eq.s32.totalorder %s146_s29, 0 }
   0xb   : > { %p1867_p8 = por %p166_p5, %p165_p3  ;;  %p209_p9 = scmp.lt.s32.totalorder %s1784_s23, 3 }
   0xc   : > { %s1873_s6 = scalar_select %p147_p7, %s1772_s20, %s149_s27  }
   0xd   : > { %p210_p10 = pnand %p1529_p6, %p209_p9 }
   0xe   : > { %p242_p11 = scmp.lt.s32.totalorder (!%p210_p10), %s1776_s21, 1  ;;  %s238_s27 = sand.u32 (!%p210_p10), 1, %s1768_s19  }
   0xf   : > { %213 = sbr.rel (%p210_p10) target bundleno = 544 (0x220), region = 40  ;;  %s1438_s15 = scalar_lea.sflag (!%p210_p10), [#allocation4], %s238_s27 }
  0x10   : > { %s1612_s29 = smul.u32 (!%p210_p10), 5, %s238_s27  ;;  %s1789_s17 = smov (!%p210_p10), [#allocation3]  }
  0x11   : > { %s1613_s10 = smul.u32 (!%p210_p10), 80, %s1776_s21 }
  0x13   : > { %s2374_s14 = scalar_lea.hbm (!%p210_p10), %s2421_s5, %s1613_s10 }
  0x14   : > { %v1786_v0 = vmov 0   ;;  %s243_s7 = scalar_select %p242_p11, %s1776_s21, 1  ;;  %v256_v33 = vlaneseq  ;;  %v293_v39 = vld [vmem:[%s2417_s1] sm:$0xf] }
  0x15   : > { %1673 = vset.pattern.permute.xlu1 %v1786_v0  ;;  %1672 = vset.pattern.permute.xlu0 %v1786_v0  ;;  %v603_v40 = vld [vmem:[%s2418_s2] sm:$0xf]  ;;  %s1712_s21 = sshll.u32 %s1789_s17, 4  ;;  %s1713_s21 = int_to_ptr.vmem [resolvable:$false] %s1712_s21 }
  0x16   : > { %s1567_s8 = sshll.u32 %s243_s7, 8  ;;  %v1915_v34 = vshrl.u32 %v256_v33, 7  ;;  %vm2348_vm0 = vcmp.lt.s32.totalorder %v256_v33, 512  ;;  %s240_s7 = scalar_lea.vmem [#allocation3], %s1612_s29  ;;  %vm1433_vm1 = vcmp.lt.s32.totalorder %v256_v33, 128 }
  0x17   : > { %s1880_s11 = scalar_lea.vmem %s2416_s0, %s1567_s8  ;;  %s1714_s24 = scalar_lea.vmem %s1713_s21, 160 }
  0x18   : > { %v263_v1 = vld [vmem:[%s1880_s11 + $0x10] sm:$0xff]  ;;  %v261_v2 = vld [vmem:[%s1880_s11] sm:$0xff]  ;;  %v264_v3 = vld [vmem:[%s1880_s11 + $0x18] sm:$0xff]  ;;  %v1918_v35 = vsub.s32 0, %v1915_v34  ;;  %v1921_v36 = vsub.s32 1, %v1915_v34  ;;  %v1924_v37 = vsub.s32 2, %v1915_v34 }
  0x19   : > { %306 = vperm.xlu1 %1673, %v263_v1   ;;  %296 = vperm.xlu0 %1672, %v261_v2   ;;  %v262_v4 = vld [vmem:[%s1880_s11 + $0x8] sm:$0xff]  ;;  %v265_v6 = vld [vmem:[%s1880_s11 + $0x20] sm:$0xff]  ;;  %v268_v7 = vld [vmem:[%s1880_s11 + $0x38] sm:$0xff]  ;;  %v1927_v38 = vsub.s32 3, %v1915_v34 }
  0x1a   : > { %v266_v5 = vld [vmem:[%s1880_s11 + $0x28] sm:$0xff]  ;;  %v267_v8 = vld [vmem:[%s1880_s11 + $0x30] sm:$0xff]  ;;  %v269_v10 = vld [vmem:[%s1880_s11 + $0x40] sm:$0xff]  ;;  %v1936_v41 = vrot.slane %v293_v39, %v1918_v35  ;;  %v1939_v42 = vrot.slane %v293_v39, %v1921_v36  ;;  %v1942_v43 = vrot.slane %v293_v39, %v1924_v37  ;;  %v1948_v45 = vrot.slane %v603_v40, %v1918_v35 }
  0x1b   : > { %v270_v9 = vld [vmem:[%s1880_s11 + $0x48] sm:$0xff]  ;;  %v272_v11 = vld [vmem:[%s1880_s11 + $0x58] sm:$0xff]  ;;  %v271_v12 = vld [vmem:[%s1880_s11 + $0x50] sm:$0xff]  ;;  %v1945_v44 = vrot.slane %v293_v39, %v1927_v38  ;;  %v1951_v46 = vrot.slane %v603_v40, %v1921_v36  ;;  %v1954_v47 = vrot.slane %v603_v40, %v1924_v37  ;;  %v1957_v48 = vrot.slane %v603_v40, %v1927_v38 }
  0x1c   : > { %v274_v13 = vld [vmem:[%s1880_s11 + $0x68] sm:$0xff]  ;;  %v273_v14 = vld [vmem:[%s1880_s11 + $0x60] sm:$0xff]  ;;  %v276_v15 = vld [vmem:[%s1880_s11 + $0x78] sm:$0xff] }
  0x1d   : > { %311 = vperm.xlu1 %1673, %v264_v3   ;;  %301 = vperm.xlu0 %1672, %v262_v4   ;;  %v275_v16 = vld [vmem:[%s1880_s11 + $0x70] sm:$0xff]  ;;  %v278_v17 = vld [vmem:[%s1880_s11 + $0x88] sm:$0xff]  ;;  %v277_v18 = vld [vmem:[%s1880_s11 + $0x80] sm:$0xff] }
  0x1e   : > { %v280_v19 = vld [vmem:[%s1880_s11 + $0x98] sm:$0xff]  ;;  %v279_v20 = vld [vmem:[%s1880_s11 + $0x90] sm:$0xff]  ;;  %v282_v21 = vld [vmem:[%s1880_s11 + $0xa8] sm:$0xff] }
  0x1f   : > { %v281_v22 = vld [vmem:[%s1880_s11 + $0xa0] sm:$0xff]  ;;  %v284_v23 = vld [vmem:[%s1880_s11 + $0xb8] sm:$0xff]  ;;  %v283_v24 = vld [vmem:[%s1880_s11 + $0xb0] sm:$0xff] }
  0x20   : > { %v286_v25 = vld [vmem:[%s1880_s11 + $0xc8] sm:$0xff]  ;;  %v285_v26 = vld [vmem:[%s1880_s11 + $0xc0] sm:$0xff]  ;;  %v288_v27 = vld [vmem:[%s1880_s11 + $0xd8] sm:$0xff] }
  0x21   : > { %321 = vperm.xlu1 %1673, %v266_v5   ;;  %316 = vperm.xlu0 %1672, %v265_v6   ;;  %v287_v28 = vld [vmem:[%s1880_s11 + $0xd0] sm:$0xff]  ;;  %v290_v29 = vld [vmem:[%s1880_s11 + $0xe8] sm:$0xff]  ;;  %v289_v30 = vld [vmem:[%s1880_s11 + $0xe0] sm:$0xff] }
  0x22   : > { %v292_v31 = vld [vmem:[%s1880_s11 + $0xf8] sm:$0xff]  ;;  %v291_v32 = vld [vmem:[%s1880_s11 + $0xf0] sm:$0xff]  ;;  %s1452_s11 = sshll.u32 %s240_s7, 4  ;;  %s1453_s11 = int_to_ptr.vmem [resolvable:$true] %s1452_s11 }
  0x23   : > { %s1708_s16 = scalar_lea.vmem %s1453_s11, 80  ;;  %p1715_p1 = scmp.lt.s32.totalorder %s1453_s11, %s1713_s21 }
  0x24   : > { %p1709_p12 = scmp.ne.s32.totalorder %s1453_s11, %s1708_s16  ;;  %p1716_p2 = scmp.lt.s32.totalorder %s1714_s24, %s1708_s16 }
  0x25   : > { %331 = vperm.xlu1 %1673, %v268_v7   ;;  %326 = vperm.xlu0 %1672, %v267_v8  }
  0x26   : > { %p1710_p13 = pnand %p1709_p12, %p1860_p4  ;;  %p1717_p3 = por %p1716_p2, %p1715_p1 }
  0x28   : > { %p1711_p0 = pneg %p1710_p13 }
  0x29   : > { %341 = vperm.xlu1 %1673, %v270_v9   ;;  %336 = vperm.xlu0 %1672, %v269_v10  }
  0x2a   : > { %p1718_p5 = pnand %p1717_p3, %p1711_p0 }
  0x2d   : > { %351 = vperm.xlu1 %1673, %v272_v11   ;;  %346 = vperm.xlu0 %1672, %v271_v12  }
  0x31   : > { %361 = vperm.xlu1 %1673, %v274_v13   ;;  %356 = vperm.xlu0 %1672, %v273_v14  }
  0x35   : > { %371 = vperm.xlu1 %1673, %v276_v15   ;;  %366 = vperm.xlu0 %1672, %v275_v16  }
  0x39   : > { %381 = vperm.xlu1 %1673, %v278_v17   ;;  %376 = vperm.xlu0 %1672, %v277_v18  }
  0x3d   : > { %391 = vperm.xlu1 %1673, %v280_v19   ;;  %386 = vperm.xlu0 %1672, %v279_v20  }
  0x41   : > { %401 = vperm.xlu1 %1673, %v282_v21   ;;  %396 = vperm.xlu0 %1672, %v281_v22   ;;  %v1674_v22 = vld [vmem:[%s2419_s3 + $0x78] sm:$0xff]  }
  0x42   : > { %1568 = vmatprep.subr.bf16.mxu0 %v1674_v22 }
  0x45   : > { %411 = vperm.xlu1 %1673, %v284_v23   ;;  %406 = vperm.xlu0 %1672, %v283_v24   ;;  %v1675_v23 = vld [vmem:[%s2419_s3 + $0xf8] sm:$0xff]  }
  0x46   : > { %1590 = vmatprep.subr.bf16.mxu1 %v1675_v23 }
  0x49   : > { %421 = vperm.xlu1 %1673, %v286_v25   ;;  %416 = vperm.xlu0 %1672, %v285_v26  }
  0x4d   : > { %431 = vperm.xlu1 %1673, %v288_v27   ;;  %426 = vperm.xlu0 %1672, %v287_v28  }
  0x51   : > { %441 = vperm.xlu1 %1673, %v290_v29   ;;  %436 = vperm.xlu0 %1672, %v289_v30   ;;  %v1676_v29 = vld [vmem:[%s2419_s3 + $0x38] sm:$0xff]  }
  0x52   : > { %v1677_v30 = vld [vmem:[%s2419_s3 + $0xb8] sm:$0xff]   ;;  %1569 = vmatpush3.bf16.msra.mxu0 %v1676_v29 }
  0x53   : > { %1591 = vmatpush3.bf16.msra.mxu1 %v1677_v30 }
  0x55   : > { %451 = vperm.xlu1 %1673, %v292_v31   ;;  %446 = vperm.xlu0 %1672, %v291_v32  }
  0x94   : > { %v307_v49 = vpop.permute.xlu1 %306  ;;  %v297_v50 = vpop.permute.xlu0 %296 }
  0x95   : > { %v483_v51 = vmul.f32 %v1936_v41, %v307_v49  ;;  %v484_v52 = vmul.f32 %v1939_v42, %v307_v49  ;;  %v485_v53 = vmul.f32 %v1942_v43, %v307_v49  ;;  %v486_v54 = vmul.f32 %v1945_v44, %v307_v49 }
  0x96   : > { %v475_v55 = vmul.f32 %v1936_v41, %v297_v50  ;;  %v476_v56 = vmul.f32 %v1939_v42, %v297_v50  ;;  %v477_v57 = vmul.f32 %v1942_v43, %v297_v50  ;;  %v478_v58 = vmul.f32 %v1945_v44, %v297_v50 }
  0x97   : > { %v1968_v59 = vadd.f32 %v1948_v45, %v483_v51  ;;  %v1971_v60 = vadd.f32 %v1951_v46, %v484_v52  ;;  %v1974_v61 = vadd.f32 %v1954_v47, %v485_v53  ;;  %v1977_v62 = vadd.f32 %v1957_v48, %v486_v54 }
  0x98   : > { %v625_v63 = vadd.f32 %v1948_v45, %v475_v55  ;;  %v312_v0 = vpop.permute.xlu1 %311  ;;  %v626_v2 = vadd.f32 %v1951_v46, %v476_v56  ;;  %v627_v3 = vadd.f32 %v1954_v47, %v477_v57  ;;  %v628_v4 = vadd.f32 %v1957_v48, %v478_v58  ;;  %v302_v5 = vpop.permute.xlu0 %301  ;;  %v1678_v57 = vld [vmem:[%s2419_s3 + $0x70] sm:$0xff]  }
  0x99   : > { %v761_v1 = vmax.f32 %v1968_v59, 0.0  ;;  %v762_v6 = vmax.f32 %v1971_v60, 0.0  ;;  %v763_v7 = vmax.f32 %v1974_v61, 0.0  ;;  %v764_v8 = vmax.f32 %v1977_v62, 0.0  ;;  %v1679_v58 = vld [vmem:[%s2419_s3 + $0xf0] sm:$0xff]   ;;  %1570 = vmatprep.subr.bf16.mxu0 %v1678_v57 }
  0x9a   : > { %v753_v9 = vmax.f32 %v625_v63, 0.0  ;;  %v487_v10 = vmul.f32 %v1936_v41, %v312_v0  ;;  %v488_v11 = vmul.f32 %v1939_v42, %v312_v0  ;;  %v489_v12 = vmul.f32 %v1942_v43, %v312_v0  ;;  %v1680_v63 = vld [vmem:[%s2419_s3 + $0x30] sm:$0xff]   ;;  %1592 = vmatprep.subr.bf16.mxu1 %v1679_v58 }
  0x9b   : > { %v490_v13 = vmul.f32 %v1945_v44, %v312_v0  ;;  %v479_v14 = vmul.f32 %v1936_v41, %v302_v5  ;;  %v480_v15 = vmul.f32 %v1939_v42, %v302_v5  ;;  %v481_v16 = vmul.f32 %v1942_v43, %v302_v5  ;;  %v1681_v0 = vld [vmem:[%s2419_s3 + $0xb0] sm:$0xff]   ;;  %1571 = vmatpush3.bf16.msra.mxu0 %v1680_v63 }
  0x9c   : > { %v482_v17 = vmul.f32 %v1945_v44, %v302_v5  ;;  %v754_v18 = vmax.f32 %v626_v2, 0.0  ;;  %v755_v19 = vmax.f32 %v627_v3, 0.0  ;;  %v756_v20 = vmax.f32 %v628_v4, 0.0  ;;  %v322_v28 = vpop.permute.xlu1 %321  ;;  %1593 = vmatpush3.bf16.msra.mxu1 %v1681_v0 }
  0x9d   : > { %v637_v21 = vadd.f32 %v1948_v45, %v487_v10  ;;  %v629_v24 = vadd.f32 %v1948_v45, %v479_v14  ;;  %v630_v25 = vadd.f32 %v1951_v46, %v480_v15  ;;  %v631_v26 = vadd.f32 %v1954_v47, %v481_v16  ;;  %v1682_v14 = vld [vmem:[%s2419_s3 + $0x68] sm:$0xff]  }
  0x9e   : > { %v632_v27 = vadd.f32 %v1957_v48, %v482_v17  ;;  %v638_v31 = vadd.f32 %v1951_v46, %v488_v11  ;;  %v639_v32 = vadd.f32 %v1954_v47, %v489_v12  ;;  %v640_v39 = vadd.f32 %v1957_v48, %v490_v13  ;;  %v317_v13 = vpop.permute.xlu0 %316  ;;  %v1683_v15 = vld [vmem:[%s2419_s3 + $0xe8] sm:$0xff]   ;;  %1572 = vmatprep.subr.bf16.mxu0 %v1682_v14 }
  0x9f   : > { %v765_v40 = vmax.f32 %v637_v21, 0.0  ;;  %v757_v49 = vmax.f32 %v629_v24, 0.0  ;;  %v758_v50 = vmax.f32 %v630_v25, 0.0  ;;  %v759_v51 = vmax.f32 %v631_v26, 0.0  ;;  %v1685_v21 = vld [vmem:[%s2419_s3 + $0xa8] sm:$0xff]   ;;  %1594 = vmatprep.subr.bf16.mxu1 %v1683_v15  ;;  %v1686_v26 = vld [vmem:[%s2419_s3 + $0x60] sm:$0xff]  }
  0xa0   : > { %v760_v52 = vmax.f32 %v632_v27, 0.0  ;;  %v495_v53 = vmul.f32 %v1936_v41, %v322_v28  ;;  %v496_v54 = vmul.f32 %v1939_v42, %v322_v28  ;;  %v497_v55 = vmul.f32 %v1942_v43, %v322_v28  ;;  %v1687_v27 = vld [vmem:[%s2419_s3 + $0xe0] sm:$0xff]   ;;  %1595 = vmatpush3.bf16.msra.mxu1 %v1685_v21 }
  0xa1   : > { %v498_v56 = vmul.f32 %v1945_v44, %v322_v28  ;;  %v882_v59 = vadd.f32 %v757_v49, %v753_v9  ;;  %v919_v60 = vadd.f32 %v758_v50, %v754_v18  ;;  %v956_v61 = vadd.f32 %v759_v51, %v755_v19  ;;  %v1688_v50 = vld [vmem:[%s2419_s3 + $0x20] sm:$0xff]   ;;  %1596 = vmatprep.subr.bf16.mxu1 %v1687_v27 }
  0xa2   : > { %v993_v62 = vadd.f32 %v760_v52, %v756_v20  ;;  %v766_v2 = vmax.f32 %v638_v31, 0.0  ;;  %v767_v3 = vmax.f32 %v639_v32, 0.0  ;;  %v768_v4 = vmax.f32 %v640_v39, 0.0 }
  0xa3   : > { %v2032_v5 = vadd.f32 %v1948_v45, %v495_v53  ;;  %v883_v10 = vadd.f32 %v882_v59, %v761_v1  ;;  %v920_v9 = vadd.f32 %v919_v60, %v762_v6  ;;  %v957_v11 = vadd.f32 %v956_v61, %v763_v7  ;;  %v332_v6 = vpop.permute.xlu1 %331  ;;  %v1684_v7 = vld [vmem:[%s2419_s3 + $0x28] sm:$0xff]   ;;  %v327_v60 = vpop.permute.xlu0 %326  ;;  %v1690_v61 = vld [vmem:[%s2419_s3 + $0x58] sm:$0xff]  }
  0xa4   : > { %v994_v12 = vadd.f32 %v993_v62, %v764_v8  ;;  %v2041_v16 = vadd.f32 %v1951_v46, %v496_v54  ;;  %v2044_v17 = vadd.f32 %v1954_v47, %v497_v55  ;;  %v2047_v1 = vadd.f32 %v1957_v48, %v498_v56  ;;  %1573 = vmatpush3.bf16.msra.mxu0 %v1684_v7  ;;  %v1689_v55 = vld [vmem:[%s2419_s3 + $0xa0] sm:$0xff]  }
  0xa5   : > { %v884_v8 = vadd.f32 %v883_v10, %v765_v40  ;;  %v921_v18 = vadd.f32 %v920_v9, %v766_v2  ;;  %v958_v19 = vadd.f32 %v957_v11, %v767_v3  ;;  %v491_v22 = vmul.f32 %v1936_v41, %v317_v13  ;;  %1574 = vmatprep.subr.bf16.mxu0 %v1686_v26  ;;  %v1691_v3 = vld [vmem:[%s2419_s3 + $0xd8] sm:$0xff]  }
  0xa6   : > { %v995_v20 = vadd.f32 %v994_v12, %v768_v4  ;;  %v492_v23 = vmul.f32 %v1939_v42, %v317_v13  ;;  %v493_v24 = vmul.f32 %v1942_v43, %v317_v13  ;;  %v494_v25 = vmul.f32 %v1945_v44, %v317_v13  ;;  %v1692_v11 = vld [vmem:[%s2419_s3 + $0x18] sm:$0xff]   ;;  %1597 = vmatpush3.bf16.msra.mxu1 %v1689_v55 }
  0xa7   : > { %v503_v28 = vmul.f32 %v1936_v41, %v332_v6  ;;  %v504_v29 = vmul.f32 %v1939_v42, %v332_v6  ;;  %v505_v30 = vmul.f32 %v1942_v43, %v332_v6  ;;  %v506_v31 = vmul.f32 %v1945_v44, %v332_v6  ;;  %1598 = vmatprep.subr.bf16.mxu1 %v1691_v3 }
  0xa8   : > { %v641_v32 = vadd.f32 %v1948_v45, %v491_v22  ;;  %v642_v39 = vadd.f32 %v1951_v46, %v492_v23  ;;  %v643_v40 = vadd.f32 %v1954_v47, %v493_v24  ;;  %v644_v49 = vadd.f32 %v1957_v48, %v494_v25  ;;  %1575 = vmatpush3.bf16.msra.mxu0 %v1688_v50 }
  0xa9   : > { %v773_v51 = vmax.f32 %v2032_v5, 0.0  ;;  %v774_v52 = vmax.f32 %v2041_v16, 0.0  ;;  %v775_v53 = vmax.f32 %v2044_v17, 0.0  ;;  %v776_v54 = vmax.f32 %v2047_v1, 0.0  ;;  %v342_v16 = vpop.permute.xlu1 %341  ;;  %v1693_v17 = vld [vmem:[%s2419_s3 + $0x98] sm:$0xff]   ;;  %v1694_v1 = vld [vmem:[%s2419_s3 + $0x50] sm:$0xff]   ;;  %1576 = vmatprep.subr.bf16.mxu0 %v1690_v61 }
  0xaa   : > { %v769_v56 = vmax.f32 %v641_v32, 0.0  ;;  %v770_v57 = vmax.f32 %v642_v39, 0.0  ;;  %v771_v58 = vmax.f32 %v643_v40, 0.0  ;;  %v772_v59 = vmax.f32 %v644_v49, 0.0  ;;  %1599 = vmatpush3.bf16.msra.mxu1 %v1693_v17  ;;  %v1697_v39 = vld [vmem:[%s2419_s3 + $0x90] sm:$0xff]  }
  0xab   : > { %v2087_v62 = vadd.f32 %v1948_v45, %v503_v28  ;;  %v2090_v63 = vadd.f32 %v1951_v46, %v504_v29  ;;  %v2093_v0 = vadd.f32 %v1954_v47, %v505_v30  ;;  %v2096_v2 = vadd.f32 %v1957_v48, %v506_v31  ;;  %v1696_v28 = vld [vmem:[%s2419_s3 + $0x10] sm:$0xff]  }
  0xac   : > { %v885_v4 = vadd.f32 %v884_v8, %v769_v56  ;;  %v922_v5 = vadd.f32 %v921_v18, %v770_v57  ;;  %v959_v10 = vadd.f32 %v958_v19, %v771_v58  ;;  %v996_v9 = vadd.f32 %v995_v20, %v772_v59  ;;  %v1695_v19 = vld [vmem:[%s2419_s3 + $0xd0] sm:$0xff]   ;;  %1577 = vmatpush3.bf16.msra.mxu0 %v1692_v11  ;;  %v337_v57 = vpop.permute.xlu0 %336  ;;  %v1699_v58 = vld [vmem:[%s2419_s3 + $0xc8] sm:$0xff]  }
  0xad   : > { %v499_v12 = vmul.f32 %v1936_v41, %v327_v60  ;;  %v500_v13 = vmul.f32 %v1939_v42, %v327_v60  ;;  %v501_v14 = vmul.f32 %v1942_v43, %v327_v60  ;;  %v502_v15 = vmul.f32 %v1945_v44, %v327_v60  ;;  %1578 = vmatprep.subr.bf16.mxu0 %v1694_v1 }
  0xae   : > { %v886_v6 = vadd.f32 %v885_v4, %v773_v51  ;;  %v923_v7 = vadd.f32 %v922_v5, %v774_v52  ;;  %v960_v8 = vadd.f32 %v959_v10, %v775_v53  ;;  %v997_v18 = vadd.f32 %v996_v9, %v776_v54  ;;  %1600 = vmatprep.subr.bf16.mxu1 %v1695_v19  ;;  %v1698_v52 = vld [vmem:[%s2419_s3 + $0x48] sm:$0xff]  }
  0xaf   : > { %v649_v20 = vadd.f32 %v1948_v45, %v499_v12  ;;  %v650_v21 = vadd.f32 %v1951_v46, %v500_v13  ;;  %v651_v22 = vadd.f32 %v1954_v47, %v501_v14  ;;  %v652_v23 = vadd.f32 %v1957_v48, %v502_v15  ;;  %1601 = vmatpush3.bf16.msra.mxu1 %v1697_v39  ;;  %v1701_v10 = vld [vmem:[%s2419_s3 + $0x88] sm:$0xff]   ;;  %v1702_v14 = vld [vmem:[%s2419_s3 + $0x40] sm:$0xff]  }
  0xb0   : > { %v511_v24 = vmul.f32 %v1936_v41, %v342_v16  ;;  %v512_v25 = vmul.f32 %v1939_v42, %v342_v16  ;;  %v513_v26 = vmul.f32 %v1942_v43, %v342_v16  ;;  %v514_v27 = vmul.f32 %v1945_v44, %v342_v16  ;;  %1579 = vmatpush3.bf16.msra.mxu0 %v1696_v28  ;;  %v1703_v15 = vld [vmem:[%s2419_s3 + $0xc0] sm:$0xff]  }
  0xb1   : > { %v777_v29 = vmax.f32 %v649_v20, 0.0  ;;  %v778_v30 = vmax.f32 %v650_v21, 0.0  ;;  %v779_v31 = vmax.f32 %v651_v22, 0.0  ;;  %v780_v32 = vmax.f32 %v652_v23, 0.0  ;;  %1580 = vmatprep.subr.bf16.mxu0 %v1698_v52  ;;  %1602 = vmatprep.subr.bf16.mxu1 %v1699_v58  ;;  %v1704_v20 = vld [vmem:[%s2419_s3] sm:$0xff]  }
  0xb2   : > { %v781_v40 = vmax.f32 %v2087_v62, 0.0  ;;  %v782_v49 = vmax.f32 %v2090_v63, 0.0  ;;  %v783_v50 = vmax.f32 %v2093_v0, 0.0  ;;  %v784_v51 = vmax.f32 %v2096_v2, 0.0  ;;  %v352_v63 = vpop.permute.xlu1 %351  ;;  %v1700_v0 = vld [vmem:[%s2419_s3 + $0x8] sm:$0xff]  }
  0xb3   : > { %v887_v53 = vadd.f32 %v886_v6, %v777_v29  ;;  %v924_v54 = vadd.f32 %v923_v7, %v778_v30  ;;  %v961_v55 = vadd.f32 %v960_v8, %v779_v31  ;;  %v998_v56 = vadd.f32 %v997_v18, %v780_v32  ;;  %1603 = vmatpush3.bf16.msra.mxu1 %v1701_v10  ;;  %v347_v30 = vpop.permute.xlu0 %346 }
  0xb4   : > { %v661_v59 = vadd.f32 %v1948_v45, %v511_v24  ;;  %v662_v60 = vadd.f32 %v1951_v46, %v512_v25  ;;  %v663_v61 = vadd.f32 %v1954_v47, %v513_v26  ;;  %v664_v62 = vadd.f32 %v1957_v48, %v514_v27  ;;  %1581 = vmatpush3.bf16.msra.mxu0 %v1700_v0  ;;  %v1705_v25 = vld [vmem:[%s2419_s3 + $0x80] sm:$0xff]  }
  0xb5   : > { %v888_v2 = vadd.f32 %v887_v53, %v781_v40  ;;  %v925_v3 = vadd.f32 %v924_v54, %v782_v49  ;;  %v962_v4 = vadd.f32 %v961_v55, %v783_v50  ;;  %v999_v5 = vadd.f32 %v998_v56, %v784_v51  ;;  %1582 = vmatprep.subr.bf16.mxu0 %v1702_v14 }
  0xb6   : > { %v507_v9 = vmul.f32 %v1936_v41, %v337_v57  ;;  %v508_v11 = vmul.f32 %v1939_v42, %v337_v57  ;;  %v509_v12 = vmul.f32 %v1942_v43, %v337_v57  ;;  %v510_v13 = vmul.f32 %v1945_v44, %v337_v57  ;;  %1604 = vmatprep.subr.bf16.mxu1 %v1703_v15  ;;  %v362_v57 = vpop.permute.xlu1 %361 }
  0xb7   : > { %v519_v16 = vmul.f32 %v1936_v41, %v352_v63  ;;  %v520_v17 = vmul.f32 %v1939_v42, %v352_v63  ;;  %v521_v1 = vmul.f32 %v1942_v43, %v352_v63  ;;  %v522_v6 = vmul.f32 %v1945_v44, %v352_v63  ;;  %1605 = vmatpush3.bf16.msra.mxu1 %v1705_v25 }
  0xb8   : > { %v657_v7 = vadd.f32 %v1948_v45, %v507_v9  ;;  %v658_v8 = vadd.f32 %v1951_v46, %v508_v11  ;;  %v659_v18 = vadd.f32 %v1954_v47, %v509_v12  ;;  %v660_v19 = vadd.f32 %v1957_v48, %v510_v13  ;;  %1583 = vmatpush3.bf16.msra.mxu0 %v1704_v20 }
  0xb9   : > { %v789_v21 = vmax.f32 %v661_v59, 0.0  ;;  %v790_v22 = vmax.f32 %v662_v60, 0.0  ;;  %v791_v23 = vmax.f32 %v663_v61, 0.0  ;;  %v792_v24 = vmax.f32 %v664_v62, 0.0 }
  0xba   : > { %v785_v26 = vmax.f32 %v657_v7, 0.0  ;;  %v786_v27 = vmax.f32 %v658_v8, 0.0  ;;  %v787_v28 = vmax.f32 %v659_v18, 0.0  ;;  %v788_v29 = vmax.f32 %v660_v19, 0.0  ;;  %v357_v18 = vpop.permute.xlu0 %356 }
  0xbb   : > { %v669_v31 = vadd.f32 %v1948_v45, %v519_v16  ;;  %v670_v32 = vadd.f32 %v1951_v46, %v520_v17  ;;  %v671_v39 = vadd.f32 %v1954_v47, %v521_v1  ;;  %v672_v40 = vadd.f32 %v1957_v48, %v522_v6 }
  0xbc   : > { %v889_v49 = vadd.f32 %v888_v2, %v785_v26  ;;  %v926_v50 = vadd.f32 %v925_v3, %v786_v27  ;;  %v963_v51 = vadd.f32 %v962_v4, %v787_v28  ;;  %v1000_v52 = vadd.f32 %v999_v5, %v788_v29 }
  0xbd   : > { %v515_v53 = vmul.f32 %v1936_v41, %v347_v30  ;;  %v516_v54 = vmul.f32 %v1939_v42, %v347_v30  ;;  %v517_v55 = vmul.f32 %v1942_v43, %v347_v30  ;;  %v518_v56 = vmul.f32 %v1945_v44, %v347_v30 }
  0xbe   : > { %v890_v58 = vadd.f32 %v889_v49, %v789_v21  ;;  %v927_v59 = vadd.f32 %v926_v50, %v790_v22  ;;  %v964_v60 = vadd.f32 %v963_v51, %v791_v23  ;;  %v1001_v61 = vadd.f32 %v1000_v52, %v792_v24  ;;  %v372_v23 = vpop.permute.xlu1 %371 }
  0xbf   : > { %v665_v62 = vadd.f32 %v1948_v45, %v515_v53  ;;  %v666_v63 = vadd.f32 %v1951_v46, %v516_v54  ;;  %v667_v0 = vadd.f32 %v1954_v47, %v517_v55  ;;  %v668_v2 = vadd.f32 %v1957_v48, %v518_v56 }
  0xc0   : > { %v527_v3 = vmul.f32 %v1936_v41, %v362_v57  ;;  %v528_v4 = vmul.f32 %v1939_v42, %v362_v57  ;;  %v529_v5 = vmul.f32 %v1942_v43, %v362_v57  ;;  %v530_v10 = vmul.f32 %v1945_v44, %v362_v57 }
  0xc1   : > { %v793_v9 = vmax.f32 %v665_v62, 0.0  ;;  %v794_v11 = vmax.f32 %v666_v63, 0.0  ;;  %v795_v12 = vmax.f32 %v667_v0, 0.0  ;;  %v796_v13 = vmax.f32 %v668_v2, 0.0  ;;  %v367_v62 = vpop.permute.xlu0 %366 }
  0xc2   : > { %v797_v14 = vmax.f32 %v669_v31, 0.0  ;;  %v798_v15 = vmax.f32 %v670_v32, 0.0  ;;  %v799_v16 = vmax.f32 %v671_v39, 0.0  ;;  %v800_v17 = vmax.f32 %v672_v40, 0.0 }
  0xc3   : > { %v891_v1 = vadd.f32 %v890_v58, %v793_v9  ;;  %v928_v6 = vadd.f32 %v927_v59, %v794_v11  ;;  %v965_v7 = vadd.f32 %v964_v60, %v795_v12  ;;  %v1002_v8 = vadd.f32 %v1001_v61, %v796_v13 }
  0xc4   : > { %v677_v19 = vadd.f32 %v1948_v45, %v527_v3  ;;  %v678_v20 = vadd.f32 %v1951_v46, %v528_v4  ;;  %v679_v21 = vadd.f32 %v1954_v47, %v529_v5  ;;  %v680_v22 = vadd.f32 %v1957_v48, %v530_v10 }
  0xc5   : > { %v892_v24 = vadd.f32 %v891_v1, %v797_v14  ;;  %v929_v25 = vadd.f32 %v928_v6, %v798_v15  ;;  %v966_v26 = vadd.f32 %v965_v7, %v799_v16  ;;  %v1003_v27 = vadd.f32 %v1002_v8, %v800_v17  ;;  %v382_v15 = vpop.permute.xlu1 %381 }
  0xc6   : > { %v523_v28 = vmul.f32 %v1936_v41, %v357_v18  ;;  %v524_v29 = vmul.f32 %v1939_v42, %v357_v18  ;;  %v525_v30 = vmul.f32 %v1942_v43, %v357_v18  ;;  %v526_v31 = vmul.f32 %v1945_v44, %v357_v18 }
  0xc7   : > { %v535_v32 = vmul.f32 %v1936_v41, %v372_v23  ;;  %v536_v39 = vmul.f32 %v1939_v42, %v372_v23  ;;  %v537_v40 = vmul.f32 %v1942_v43, %v372_v23  ;;  %v538_v49 = vmul.f32 %v1945_v44, %v372_v23 }
  0xc8   : > { %v673_v50 = vadd.f32 %v1948_v45, %v523_v28  ;;  %v674_v51 = vadd.f32 %v1951_v46, %v524_v29  ;;  %v675_v52 = vadd.f32 %v1954_v47, %v525_v30  ;;  %v676_v53 = vadd.f32 %v1957_v48, %v526_v31 }
  0xc9   : > { %v805_v54 = vmax.f32 %v677_v19, 0.0  ;;  %v806_v55 = vmax.f32 %v678_v20, 0.0  ;;  %v807_v56 = vmax.f32 %v679_v21, 0.0  ;;  %v808_v57 = vmax.f32 %v680_v22, 0.0 }
  0xca   : > { %v801_v58 = vmax.f32 %v673_v50, 0.0  ;;  %v802_v59 = vmax.f32 %v674_v51, 0.0  ;;  %v803_v60 = vmax.f32 %v675_v52, 0.0  ;;  %v804_v61 = vmax.f32 %v676_v53, 0.0  ;;  %v377_v50 = vpop.permute.xlu0 %376 }
  0xcb   : > { %v685_v63 = vadd.f32 %v1948_v45, %v535_v32  ;;  %v686_v0 = vadd.f32 %v1951_v46, %v536_v39  ;;  %v687_v2 = vadd.f32 %v1954_v47, %v537_v40  ;;  %v688_v3 = vadd.f32 %v1957_v48, %v538_v49 }
  0xcc   : > { %v893_v4 = vadd.f32 %v892_v24, %v801_v58  ;;  %v930_v5 = vadd.f32 %v929_v25, %v802_v59  ;;  %v967_v10 = vadd.f32 %v966_v26, %v803_v60  ;;  %v1004_v9 = vadd.f32 %v1003_v27, %v804_v61 }
  0xcd   : > { %v531_v11 = vmul.f32 %v1936_v41, %v367_v62  ;;  %v532_v12 = vmul.f32 %v1939_v42, %v367_v62  ;;  %v533_v13 = vmul.f32 %v1942_v43, %v367_v62  ;;  %v534_v14 = vmul.f32 %v1945_v44, %v367_v62 }
  0xce   : > { %v894_v16 = vadd.f32 %v893_v4, %v805_v54  ;;  %v931_v17 = vadd.f32 %v930_v5, %v806_v55  ;;  %v968_v1 = vadd.f32 %v967_v10, %v807_v56  ;;  %v1005_v6 = vadd.f32 %v1004_v9, %v808_v57  ;;  %v392_v55 = vpop.permute.xlu1 %391 }
  0xcf   : > { %v681_v7 = vadd.f32 %v1948_v45, %v531_v11  ;;  %v682_v8 = vadd.f32 %v1951_v46, %v532_v12  ;;  %v683_v18 = vadd.f32 %v1954_v47, %v533_v13  ;;  %v684_v19 = vadd.f32 %v1957_v48, %v534_v14 }
  0xd0   : > { %v543_v20 = vmul.f32 %v1936_v41, %v382_v15  ;;  %v544_v21 = vmul.f32 %v1939_v42, %v382_v15  ;;  %v545_v22 = vmul.f32 %v1942_v43, %v382_v15  ;;  %v546_v23 = vmul.f32 %v1945_v44, %v382_v15 }
  0xd1   : > { %v809_v24 = vmax.f32 %v681_v7, 0.0  ;;  %v810_v25 = vmax.f32 %v682_v8, 0.0  ;;  %v811_v26 = vmax.f32 %v683_v18, 0.0  ;;  %v812_v27 = vmax.f32 %v684_v19, 0.0  ;;  %v387_v7 = vpop.permute.xlu0 %386 }
  0xd2   : > { %v813_v28 = vmax.f32 %v685_v63, 0.0  ;;  %v814_v29 = vmax.f32 %v686_v0, 0.0  ;;  %v815_v30 = vmax.f32 %v687_v2, 0.0  ;;  %v816_v31 = vmax.f32 %v688_v3, 0.0 }
  0xd3   : > { %v895_v32 = vadd.f32 %v894_v16, %v809_v24  ;;  %v932_v39 = vadd.f32 %v931_v17, %v810_v25  ;;  %v969_v40 = vadd.f32 %v968_v1, %v811_v26  ;;  %v1006_v49 = vadd.f32 %v1005_v6, %v812_v27 }
  0xd4   : > { %v693_v51 = vadd.f32 %v1948_v45, %v543_v20  ;;  %v694_v52 = vadd.f32 %v1951_v46, %v544_v21  ;;  %v695_v53 = vadd.f32 %v1954_v47, %v545_v22  ;;  %v696_v54 = vadd.f32 %v1957_v48, %v546_v23 }
  0xd5   : > { %v896_v56 = vadd.f32 %v895_v32, %v813_v28  ;;  %v933_v57 = vadd.f32 %v932_v39, %v814_v29  ;;  %v970_v58 = vadd.f32 %v969_v40, %v815_v30  ;;  %v1007_v59 = vadd.f32 %v1006_v49, %v816_v31  ;;  %v402_v29 = vpop.permute.xlu1 %401 }
  0xd6   : > { %v539_v60 = vmul.f32 %v1936_v41, %v377_v50  ;;  %v540_v61 = vmul.f32 %v1939_v42, %v377_v50  ;;  %v541_v62 = vmul.f32 %v1942_v43, %v377_v50  ;;  %v542_v63 = vmul.f32 %v1945_v44, %v377_v50 }
  0xd7   : > { %v551_v0 = vmul.f32 %v1936_v41, %v392_v55  ;;  %v552_v2 = vmul.f32 %v1939_v42, %v392_v55  ;;  %v553_v3 = vmul.f32 %v1942_v43, %v392_v55  ;;  %v554_v4 = vmul.f32 %v1945_v44, %v392_v55 }
  0xd8   : > { %v689_v5 = vadd.f32 %v1948_v45, %v539_v60  ;;  %v690_v10 = vadd.f32 %v1951_v46, %v540_v61  ;;  %v691_v9 = vadd.f32 %v1954_v47, %v541_v62  ;;  %v692_v11 = vadd.f32 %v1957_v48, %v542_v63 }
  0xd9   : > { %v821_v12 = vmax.f32 %v693_v51, 0.0  ;;  %v822_v13 = vmax.f32 %v694_v52, 0.0  ;;  %v823_v14 = vmax.f32 %v695_v53, 0.0  ;;  %v824_v15 = vmax.f32 %v696_v54, 0.0 }
  0xda   : > { %v817_v16 = vmax.f32 %v689_v5, 0.0  ;;  %v818_v17 = vmax.f32 %v690_v10, 0.0  ;;  %v819_v1 = vmax.f32 %v691_v9, 0.0  ;;  %v820_v6 = vmax.f32 %v692_v11, 0.0  ;;  %v397_v5 = vpop.permute.xlu0 %396 }
  0xdb   : > { %v701_v8 = vadd.f32 %v1948_v45, %v551_v0  ;;  %v702_v18 = vadd.f32 %v1951_v46, %v552_v2  ;;  %v703_v19 = vadd.f32 %v1954_v47, %v553_v3  ;;  %v704_v20 = vadd.f32 %v1957_v48, %v554_v4 }
  0xdc   : > { %v897_v21 = vadd.f32 %v896_v56, %v817_v16  ;;  %v934_v22 = vadd.f32 %v933_v57, %v818_v17  ;;  %v971_v23 = vadd.f32 %v970_v58, %v819_v1  ;;  %v1008_v24 = vadd.f32 %v1007_v59, %v820_v6 }
  0xdd   : > { %v547_v25 = vmul.f32 %v1936_v41, %v387_v7  ;;  %v548_v26 = vmul.f32 %v1939_v42, %v387_v7  ;;  %v549_v27 = vmul.f32 %v1942_v43, %v387_v7  ;;  %v550_v28 = vmul.f32 %v1945_v44, %v387_v7 }
  0xde   : > { %v898_v30 = vadd.f32 %v897_v21, %v821_v12  ;;  %v935_v31 = vadd.f32 %v934_v22, %v822_v13  ;;  %v972_v32 = vadd.f32 %v971_v23, %v823_v14  ;;  %v1009_v39 = vadd.f32 %v1008_v24, %v824_v15  ;;  %v412_v13 = vpop.permute.xlu1 %411 }
  0xdf   : > { %v697_v40 = vadd.f32 %v1948_v45, %v547_v25  ;;  %v698_v49 = vadd.f32 %v1951_v46, %v548_v26  ;;  %v699_v50 = vadd.f32 %v1954_v47, %v549_v27  ;;  %v700_v51 = vadd.f32 %v1957_v48, %v550_v28 }
  0xe0   : > { %v559_v52 = vmul.f32 %v1936_v41, %v402_v29  ;;  %v560_v53 = vmul.f32 %v1939_v42, %v402_v29  ;;  %v561_v54 = vmul.f32 %v1942_v43, %v402_v29  ;;  %v562_v55 = vmul.f32 %v1945_v44, %v402_v29 }
  0xe1   : > { %v825_v56 = vmax.f32 %v697_v40, 0.0  ;;  %v826_v57 = vmax.f32 %v698_v49, 0.0  ;;  %v827_v58 = vmax.f32 %v699_v50, 0.0  ;;  %v828_v59 = vmax.f32 %v700_v51, 0.0  ;;  %v407_v40 = vpop.permute.xlu0 %406 }
  0xe2   : > { %v829_v60 = vmax.f32 %v701_v8, 0.0  ;;  %v830_v61 = vmax.f32 %v702_v18, 0.0  ;;  %v831_v62 = vmax.f32 %v703_v19, 0.0  ;;  %v832_v63 = vmax.f32 %v704_v20, 0.0 }
  0xe3   : > { %v899_v0 = vadd.f32 %v898_v30, %v825_v56  ;;  %v936_v2 = vadd.f32 %v935_v31, %v826_v57  ;;  %v973_v3 = vadd.f32 %v972_v32, %v827_v58  ;;  %v1010_v4 = vadd.f32 %v1009_v39, %v828_v59 }
  0xe4   : > { %v709_v10 = vadd.f32 %v1948_v45, %v559_v52  ;;  %v710_v9 = vadd.f32 %v1951_v46, %v560_v53  ;;  %v711_v11 = vadd.f32 %v1954_v47, %v561_v54  ;;  %v712_v12 = vadd.f32 %v1957_v48, %v562_v55 }
  0xe5   : > { %v900_v14 = vadd.f32 %v899_v0, %v829_v60  ;;  %v937_v15 = vadd.f32 %v936_v2, %v830_v61  ;;  %v974_v16 = vadd.f32 %v973_v3, %v831_v62  ;;  %v1011_v17 = vadd.f32 %v1010_v4, %v832_v63  ;;  %v422_v61 = vpop.permute.xlu1 %421 }
  0xe6   : > { %v555_v1 = vmul.f32 %v1936_v41, %v397_v5  ;;  %v556_v6 = vmul.f32 %v1939_v42, %v397_v5  ;;  %v557_v7 = vmul.f32 %v1942_v43, %v397_v5  ;;  %v558_v8 = vmul.f32 %v1945_v44, %v397_v5 }
  0xe7   : > { %v567_v18 = vmul.f32 %v1936_v41, %v412_v13  ;;  %v568_v19 = vmul.f32 %v1939_v42, %v412_v13  ;;  %v569_v20 = vmul.f32 %v1942_v43, %v412_v13  ;;  %v570_v21 = vmul.f32 %v1945_v44, %v412_v13 }
  0xe8   : > { %v705_v22 = vadd.f32 %v1948_v45, %v555_v1  ;;  %v706_v23 = vadd.f32 %v1951_v46, %v556_v6  ;;  %v707_v24 = vadd.f32 %v1954_v47, %v557_v7  ;;  %v708_v25 = vadd.f32 %v1957_v48, %v558_v8 }
  0xe9   : > { %v837_v26 = vmax.f32 %v709_v10, 0.0  ;;  %v838_v27 = vmax.f32 %v710_v9, 0.0  ;;  %v839_v28 = vmax.f32 %v711_v11, 0.0  ;;  %v840_v29 = vmax.f32 %v712_v12, 0.0 }
  0xea   : > { %v833_v30 = vmax.f32 %v705_v22, 0.0  ;;  %v834_v31 = vmax.f32 %v706_v23, 0.0  ;;  %v835_v32 = vmax.f32 %v707_v24, 0.0  ;;  %v836_v39 = vmax.f32 %v708_v25, 0.0  ;;  %v417_v22 = vpop.permute.xlu0 %416 }
  0xeb   : > { %v717_v49 = vadd.f32 %v1948_v45, %v567_v18  ;;  %v718_v50 = vadd.f32 %v1951_v46, %v568_v19  ;;  %v719_v51 = vadd.f32 %v1954_v47, %v569_v20  ;;  %v720_v52 = vadd.f32 %v1957_v48, %v570_v21 }
  0xec   : > { %v901_v53 = vadd.f32 %v900_v14, %v833_v30  ;;  %v938_v54 = vadd.f32 %v937_v15, %v834_v31  ;;  %v975_v55 = vadd.f32 %v974_v16, %v835_v32  ;;  %v1012_v56 = vadd.f32 %v1011_v17, %v836_v39 }
  0xed   : > { %v563_v57 = vmul.f32 %v1936_v41, %v407_v40  ;;  %v564_v58 = vmul.f32 %v1939_v42, %v407_v40  ;;  %v565_v59 = vmul.f32 %v1942_v43, %v407_v40  ;;  %v566_v60 = vmul.f32 %v1945_v44, %v407_v40 }
  0xee   : > { %v902_v62 = vadd.f32 %v901_v53, %v837_v26  ;;  %v939_v63 = vadd.f32 %v938_v54, %v838_v27  ;;  %v976_v0 = vadd.f32 %v975_v55, %v839_v28  ;;  %v1013_v2 = vadd.f32 %v1012_v56, %v840_v29  ;;  %v432_v27 = vpop.permute.xlu1 %431 }
  0xef   : > { %v713_v3 = vadd.f32 %v1948_v45, %v563_v57  ;;  %v714_v4 = vadd.f32 %v1951_v46, %v564_v58  ;;  %v715_v5 = vadd.f32 %v1954_v47, %v565_v59  ;;  %v716_v10 = vadd.f32 %v1957_v48, %v566_v60 }
  0xf0   : > { %v575_v9 = vmul.f32 %v1936_v41, %v422_v61  ;;  %v576_v11 = vmul.f32 %v1939_v42, %v422_v61  ;;  %v577_v12 = vmul.f32 %v1942_v43, %v422_v61  ;;  %v578_v13 = vmul.f32 %v1945_v44, %v422_v61 }
  0xf1   : > { %v841_v14 = vmax.f32 %v713_v3, 0.0  ;;  %v842_v15 = vmax.f32 %v714_v4, 0.0  ;;  %v843_v16 = vmax.f32 %v715_v5, 0.0  ;;  %v844_v17 = vmax.f32 %v716_v10, 0.0  ;;  %v427_v3 = vpop.permute.xlu0 %426 }
  0xf2   : > { %v845_v1 = vmax.f32 %v717_v49, 0.0  ;;  %v846_v6 = vmax.f32 %v718_v50, 0.0  ;;  %v847_v7 = vmax.f32 %v719_v51, 0.0  ;;  %v848_v8 = vmax.f32 %v720_v52, 0.0 }
  0xf3   : > { %v903_v18 = vadd.f32 %v902_v62, %v841_v14  ;;  %v940_v19 = vadd.f32 %v939_v63, %v842_v15  ;;  %v977_v20 = vadd.f32 %v976_v0, %v843_v16  ;;  %v1014_v21 = vadd.f32 %v1013_v2, %v844_v17 }
  0xf4   : > { %v725_v23 = vadd.f32 %v1948_v45, %v575_v9  ;;  %v726_v24 = vadd.f32 %v1951_v46, %v576_v11  ;;  %v727_v25 = vadd.f32 %v1954_v47, %v577_v12  ;;  %v728_v26 = vadd.f32 %v1957_v48, %v578_v13 }
  0xf5   : > { %v904_v28 = vadd.f32 %v903_v18, %v845_v1  ;;  %v941_v29 = vadd.f32 %v940_v19, %v846_v6  ;;  %v978_v30 = vadd.f32 %v977_v20, %v847_v7  ;;  %v1015_v31 = vadd.f32 %v1014_v21, %v848_v8  ;;  %v442_v6 = vpop.permute.xlu1 %441 }
  0xf6   : > { %v571_v32 = vmul.f32 %v1936_v41, %v417_v22  ;;  %v572_v39 = vmul.f32 %v1939_v42, %v417_v22  ;;  %v573_v40 = vmul.f32 %v1942_v43, %v417_v22  ;;  %v574_v49 = vmul.f32 %v1945_v44, %v417_v22 }
  0xf7   : > { %v583_v50 = vmul.f32 %v1936_v41, %v432_v27  ;;  %v584_v51 = vmul.f32 %v1939_v42, %v432_v27  ;;  %v585_v52 = vmul.f32 %v1942_v43, %v432_v27  ;;  %v586_v53 = vmul.f32 %v1945_v44, %v432_v27 }
  0xf8   : > { %v721_v54 = vadd.f32 %v1948_v45, %v571_v32  ;;  %v722_v55 = vadd.f32 %v1951_v46, %v572_v39  ;;  %v723_v56 = vadd.f32 %v1954_v47, %v573_v40  ;;  %v724_v57 = vadd.f32 %v1957_v48, %v574_v49 }
  0xf9   : > { %v853_v58 = vmax.f32 %v725_v23, 0.0  ;;  %v854_v59 = vmax.f32 %v726_v24, 0.0  ;;  %v855_v60 = vmax.f32 %v727_v25, 0.0  ;;  %v856_v61 = vmax.f32 %v728_v26, 0.0 }
  0xfa   : > { %v849_v62 = vmax.f32 %v721_v54, 0.0  ;;  %v850_v63 = vmax.f32 %v722_v55, 0.0  ;;  %v851_v0 = vmax.f32 %v723_v56, 0.0  ;;  %v852_v2 = vmax.f32 %v724_v57, 0.0  ;;  %v437_v54 = vpop.permute.xlu0 %436 }
  0xfb   : > { %v733_v4 = vadd.f32 %v1948_v45, %v583_v50  ;;  %v734_v5 = vadd.f32 %v1951_v46, %v584_v51  ;;  %v735_v10 = vadd.f32 %v1954_v47, %v585_v52  ;;  %v736_v9 = vadd.f32 %v1957_v48, %v586_v53 }
  0xfc   : > { %v905_v11 = vadd.f32 %v904_v28, %v849_v62  ;;  %v942_v12 = vadd.f32 %v941_v29, %v850_v63  ;;  %v979_v13 = vadd.f32 %v978_v30, %v851_v0  ;;  %v1016_v14 = vadd.f32 %v1015_v31, %v852_v2 }
  0xfd   : > { %v579_v15 = vmul.f32 %v1936_v41, %v427_v3  ;;  %v580_v16 = vmul.f32 %v1939_v42, %v427_v3  ;;  %v581_v17 = vmul.f32 %v1942_v43, %v427_v3  ;;  %v582_v1 = vmul.f32 %v1945_v44, %v427_v3 }
  0xfe   : > { %v906_v7 = vadd.f32 %v905_v11, %v853_v58  ;;  %v943_v8 = vadd.f32 %v942_v12, %v854_v59  ;;  %v980_v18 = vadd.f32 %v979_v13, %v855_v60  ;;  %v1017_v19 = vadd.f32 %v1016_v14, %v856_v61  ;;  %v452_v59 = vpop.permute.xlu1 %451 }
  0xff   : > { %v729_v20 = vadd.f32 %v1948_v45, %v579_v15  ;;  %v730_v21 = vadd.f32 %v1951_v46, %v580_v16  ;;  %v731_v22 = vadd.f32 %v1954_v47, %v581_v17  ;;  %v732_v23 = vadd.f32 %v1957_v48, %v582_v1 }
 0x100   : > { %v591_v24 = vmul.f32 %v1936_v41, %v442_v6  ;;  %v592_v25 = vmul.f32 %v1939_v42, %v442_v6  ;;  %v593_v26 = vmul.f32 %v1942_v43, %v442_v6  ;;  %v594_v27 = vmul.f32 %v1945_v44, %v442_v6 }
 0x101   : > { %v857_v28 = vmax.f32 %v729_v20, 0.0  ;;  %v858_v29 = vmax.f32 %v730_v21, 0.0  ;;  %v859_v30 = vmax.f32 %v731_v22, 0.0  ;;  %v860_v31 = vmax.f32 %v732_v23, 0.0  ;;  %v447_v20 = vpop.permute.xlu0 %446 }
 0x102   : > { %v861_v32 = vmax.f32 %v733_v4, 0.0  ;;  %v862_v39 = vmax.f32 %v734_v5, 0.0  ;;  %v863_v40 = vmax.f32 %v735_v10, 0.0  ;;  %v864_v49 = vmax.f32 %v736_v9, 0.0 }
 0x103   : > { %v907_v50 = vadd.f32 %v906_v7, %v857_v28  ;;  %v944_v51 = vadd.f32 %v943_v8, %v858_v29  ;;  %v981_v52 = vadd.f32 %v980_v18, %v859_v30  ;;  %v1018_v53 = vadd.f32 %v1017_v19, %v860_v31 }
 0x104   : > { %v741_v55 = vadd.f32 %v1948_v45, %v591_v24  ;;  %v742_v56 = vadd.f32 %v1951_v46, %v592_v25  ;;  %v743_v57 = vadd.f32 %v1954_v47, %v593_v26  ;;  %v744_v58 = vadd.f32 %v1957_v48, %v594_v27 }
 0x105   : > { %v908_v60 = vadd.f32 %v907_v50, %v861_v32  ;;  %v945_v61 = vadd.f32 %v944_v51, %v862_v39  ;;  %v982_v62 = vadd.f32 %v981_v52, %v863_v40  ;;  %v1019_v63 = vadd.f32 %v1018_v53, %v864_v49 }
 0x106   : > { %v587_v0 = vmul.f32 %v1936_v41, %v437_v54  ;;  %v588_v2 = vmul.f32 %v1939_v42, %v437_v54  ;;  %v589_v3 = vmul.f32 %v1942_v43, %v437_v54  ;;  %v590_v4 = vmul.f32 %v1945_v44, %v437_v54 }
 0x107   : > { %v599_v5 = vmul.f32 %v1936_v41, %v452_v59  ;;  %v600_v10 = vmul.f32 %v1939_v42, %v452_v59  ;;  %v601_v9 = vmul.f32 %v1942_v43, %v452_v59  ;;  %v602_v11 = vmul.f32 %v1945_v44, %v452_v59 }
 0x108   : > { %v737_v12 = vadd.f32 %v1948_v45, %v587_v0  ;;  %v738_v13 = vadd.f32 %v1951_v46, %v588_v2  ;;  %v739_v14 = vadd.f32 %v1954_v47, %v589_v3  ;;  %v740_v15 = vadd.f32 %v1957_v48, %v590_v4 }
 0x109   : > { %v869_v16 = vmax.f32 %v741_v55, 0.0  ;;  %v870_v17 = vmax.f32 %v742_v56, 0.0  ;;  %v871_v1 = vmax.f32 %v743_v57, 0.0  ;;  %v872_v6 = vmax.f32 %v744_v58, 0.0 }
 0x10a   : > { %v865_v7 = vmax.f32 %v737_v12, 0.0  ;;  %v866_v8 = vmax.f32 %v738_v13, 0.0  ;;  %v867_v18 = vmax.f32 %v739_v14, 0.0  ;;  %v868_v19 = vmax.f32 %v740_v15, 0.0 }
 0x10b   : > { %v749_v21 = vadd.f32 %v1948_v45, %v599_v5  ;;  %v750_v22 = vadd.f32 %v1951_v46, %v600_v10  ;;  %v751_v23 = vadd.f32 %v1954_v47, %v601_v9  ;;  %v752_v24 = vadd.f32 %v1957_v48, %v602_v11 }
 0x10c   : > { %v909_v25 = vadd.f32 %v908_v60, %v865_v7  ;;  %v946_v26 = vadd.f32 %v945_v61, %v866_v8  ;;  %v983_v27 = vadd.f32 %v982_v62, %v867_v18  ;;  %v1020_v28 = vadd.f32 %v1019_v63, %v868_v19 }
 0x10d   : > { %v595_v29 = vmul.f32 %v1936_v41, %v447_v20  ;;  %v596_v30 = vmul.f32 %v1939_v42, %v447_v20  ;;  %v597_v31 = vmul.f32 %v1942_v43, %v447_v20  ;;  %v598_v32 = vmul.f32 %v1945_v44, %v447_v20 }
 0x10e   : > { %v910_v39 = vadd.f32 %v909_v25, %v869_v16  ;;  %v947_v40 = vadd.f32 %v946_v26, %v870_v17  ;;  %v984_v49 = vadd.f32 %v983_v27, %v871_v1  ;;  %v1021_v50 = vadd.f32 %v1020_v28, %v872_v6 }
 0x10f   : > { %v745_v51 = vadd.f32 %v1948_v45, %v595_v29  ;;  %v746_v52 = vadd.f32 %v1951_v46, %v596_v30  ;;  %v747_v53 = vadd.f32 %v1954_v47, %v597_v31  ;;  %v748_v54 = vadd.f32 %v1957_v48, %v598_v32 }
 0x110   : > { %v1787_v56 = vmov 0.0   ;;  %v877_v45 = vmax.f32 %v749_v21, 0.0  ;;  %v878_v57 = vmax.f32 %v750_v22, 0.0  ;;  %v879_v46 = vmax.f32 %v751_v23, 0.0 }
 0x111   : > { %v873_v42 = vmax.f32 %v745_v51, 0.0  ;;  %v874_v43 = vmax.f32 %v746_v52, 0.0  ;;  %v875_v44 = vmax.f32 %v747_v53, 0.0  ;;  %v876_v55 = vmax.f32 %v748_v54, 0.0  ;;  %260 = vst.msk [vmem:[#allocation2] sm:$0xf] %vm2348_vm0, %v1787_v56 }
 0x112   : > { %v880_v58 = vmax.f32 %v752_v24, 0.0  ;;  %v1788_v10 = vmov 1966171168  }
 0x113   : > { %v911_v47 = vadd.f32 %v910_v39, %v873_v42  ;;  %v948_v59 = vadd.f32 %v947_v40, %v874_v43  ;;  %v985_v48 = vadd.f32 %v984_v49, %v875_v44  ;;  %v1022_v60 = vadd.f32 %v1021_v50, %v876_v55 }
 0x114   : > { %v1037_v9 = vunpack.c.l.s4 %v1788_v10 }
 0x115   : > { %v912_v61 = vadd.f32 %v911_v47, %v877_v45  ;;  %v949_v62 = vadd.f32 %v948_v59, %v878_v57  ;;  %v986_v63 = vadd.f32 %v985_v48, %v879_v46  ;;  %v1023_v0 = vadd.f32 %v1022_v60, %v880_v58 }
 0x116   : > { %v1038_v6 = vunpack.c.0.s8 %v1037_v9 }
 0x117   : > { %v913_v2 = vrot.slane %v912_v61, 4  ;;  %v950_v3 = vrot.slane %v949_v62, 4  ;;  %v987_v4 = vrot.slane %v986_v63, 4  ;;  %v1024_v5 = vrot.slane %v1023_v0, 4 }
 0x118   : > { %v1041_v24 = vsub.s32 %v1038_v6, %v1915_v34  ;;  %v881_v40 = vld [vmem:[#allocation2] sm:$0xf] }
 0x119   : > { %v914_v11 = vadd.f32 %v913_v2, %v912_v61  ;;  %v951_v12 = vadd.f32 %v950_v3, %v949_v62  ;;  %v988_v13 = vadd.f32 %v987_v4, %v986_v63  ;;  %v1025_v14 = vadd.f32 %v1024_v5, %v1023_v0 }
 0x11b   : > { %v915_v15 = vrot.slane %v914_v11, 2  ;;  %v952_v16 = vrot.slane %v951_v12, 2  ;;  %v989_v17 = vrot.slane %v988_v13, 2  ;;  %v1026_v1 = vrot.slane %v1025_v14, 2 }
 0x11d   : > { %v916_v7 = vadd.f32 %v915_v15, %v914_v11  ;;  %v953_v8 = vadd.f32 %v952_v16, %v951_v12  ;;  %v990_v18 = vadd.f32 %v989_v17, %v988_v13  ;;  %v1027_v19 = vadd.f32 %v1026_v1, %v1025_v14 }
 0x11f   : > { %v917_v20 = vrot.slane %v916_v7, 1  ;;  %v954_v21 = vrot.slane %v953_v8, 1  ;;  %v991_v22 = vrot.slane %v990_v18, 1  ;;  %v1028_v23 = vrot.slane %v1027_v19, 1 }
 0x121   : > { %v918_v25 = vadd.f32 %v917_v20, %v916_v7  ;;  %v955_v26 = vadd.f32 %v954_v21, %v953_v8  ;;  %v992_v27 = vadd.f32 %v991_v22, %v990_v18  ;;  %v1029_v28 = vadd.f32 %v1028_v23, %v1027_v19 }
 0x123   : > { %v1034_v29 = vcombine.low %v918_v25, %v955_v26  ;;  %v1035_v30 = vcombine.low %v992_v27, %v1029_v28 }
 0x125   : > { %v1042_v31 = vrot.slane %v1034_v29, %v1041_v24  ;;  %v1049_v32 = vrot.slane %v1035_v30, %v1041_v24 }
 0x127   : > { %v1050_v39 = vcombine.low %v1042_v31, %v1049_v32 }
 0x129   : > { %v1057_v49 = vrot.slane %v1050_v39, %v1041_v24 }
 0x12b   : > { %v1059_v50 = vadd.f32 %v1057_v49, %v881_v40 }
 0x12d   : > { %1064 = vst.msk [vmem:[#allocation2] sm:$0xf] %vm2348_vm0, %v1059_v50 }
 0x134   : > { %v1068_v51 = vld [vmem:[#allocation2] sm:$0xf] }
 0x135   : > { %v1069_v34 = vmul.f32 0.00390625, %v1068_v51 }
 0x137   : > { %v1078_v52 = vrot.slane %v1069_v34, %v1921_v36  ;;  %v1086_v53 = vrot.slane %v1069_v34, %v1927_v38  ;;  %v1074_v54 = vrot.slane %v1069_v34, %v1918_v35  ;;  %v1082_v42 = vrot.slane %v1069_v34, %v1924_v37  ;;  %1436 = vst.msk [vmem:[%s240_s7 + $0x1] sm:$0xf] %vm2348_vm0, %v1069_v34  ;;  %v1159_v35 = vld [vmem:[%s2420_s4] sm:$0x1] }
 0x139   : > { %v1092_v43 = vpack.c.bf16 %v1078_v52, %v1078_v52  ;;  %v1094_v44 = vpack.c.bf16 %v1086_v53, %v1086_v53  ;;  %v1091_v55 = vpack.c.bf16 %v1074_v54, %v1074_v54  ;;  %v1093_v56 = vpack.c.bf16 %v1082_v42, %v1082_v42 }
 0x13b   : > { %1384 = vmatprep.mubr.bf16.mxu0 %v1092_v43  ;;  %1424 = vmatprep.mubr.bf16.mxu1 %v1094_v44 }
 0x13c   : > { %1385 = vmatmul.mubr.bf16.vlgmr.msra.gmra.mxu0 %v1091_v55  ;;  %1425 = vmatmul.mubr.bf16.vlgmr.msra.gmra.mxu1 %v1093_v56 }
 0x1fc   : > { %v1584_v36 = vpop.f32.mrf.mxu0  ;;  %v1606_v45 = vpop.f32.mrf.mxu1 }
 0x1fe   : > { %v1585_v37 = vpop.f32.mrf.mxu0  ;;  %v1607_v38 = vpop.f32.mrf.mxu1 }
 0x1ff   : > { %v1586_v57 = vadd.f32 %v1585_v37, %v1584_v36  ;;  %v1608_v47 = vadd.f32 %v1607_v38, %v1606_v45 }
 0x200   : > { %v1587_v41 = vpop.f32.mrf.mxu0  ;;  %v1609_v46 = vpop.f32.mrf.mxu1 }
 0x201   : > { %v1387_v58 = vadd.f32 %v1586_v57, %v1159_v35 }
 0x202   : > { %v1588_v59 = vpop.f32.mrf.mxu0  ;;  %v1610_v48 = vpop.f32.mrf.mxu1 }
 0x203   : > { %v1427_v60 = vadd.f32 %v1608_v47, %v1387_v58 }
 0x205   : > { %1706 = vtanh.f32 %v1427_v60 }
 0x212   : > { %v1707_v61 = vpop.eup %1706 }
 0x213   : > { %1435 = vst.msk [vmem:[%s240_s7] sm:$0x1] %vm1433_vm1, %v1707_v61 }
 0x214   : > { %1721 = shalt.err (!%p1718_p5)
}
 0x215   : > { %s1722_s25 = scalar_lea.hbm %s2374_s14, 80  ;;  %s1726_s7 = scalar_lea.hbm %s2421_s5, 160 }
 0x216   : > { %p1723_p6 = scmp.ne.s32.totalorder %s2374_s14, %s1722_s25  ;;  %p1727_p10 = scmp.lt.s32.totalorder %s2374_s14, %s2421_s5 }
 0x217   : > { %p1728_p11 = scmp.lt.s32.totalorder %s1726_s7, %s1722_s25 }
 0x218   : > { %p1724_p7 = pnand %p1723_p6, %p1860_p4 }
 0x219   : > { %p1729_p12 = por %p1728_p11, %p1727_p10 }
 0x21a   : > { %p1725_p9 = pneg %p1724_p7 }
 0x21c   : > { %p1730_p13 = pnand %p1729_p12, %p1725_p9 }
 0x21e   : > { %1733 = shalt.err (!%p1730_p13)
}
 0x21f   : > { %1614 = dma.vmem_to_hbm [thread:$0]  (%p1860_p4), %s1453_s11, 80, %s2374_s14, %s1438_s15  }
 0x220 PF: > { %p1620_p0 = scmp.ge.s32.totalorder %s1784_s23, 2  ;;  %s1464_s10 = sand.u32 1, %s1764_s18  }
 0x221   : > { %s1465_s12 = scalar_lea.sflag [#allocation4], %s1464_s10 }
 0x222   : > { %p1617_p1 = pnand %p1620_p0, %p1867_p8 }
 0x224   : > { %p1618_p2 = pneg %p1617_p1 }
 0x226   : > { %1759 = dma.done.wait (%p1618_p2), %s1465_s12, 80  }
 0x227   : > { %1761 = vsyncadd (%p1618_p2), %s1465_s12, 4294967216  ;;  %s18_s23 = sadd.s32 1, %s1784_s23   ;;  %s2426_s18 = smov %s1768_s19 }
 0x228   : > { %p15_p3 = scmp.ge.s32.totalorder %s18_s23, 4   ;;  %s2427_s19 = smov %s1772_s20 }
 0x229   : > { %s2428_s20 = smov %s1873_s6  ;;  %s2429_s21 = smov %s1780_s22 }
 0x22a   : > { %s2430_s22 = smov %s2432_s26  ;;  %17 = sbr.rel (!%p15_p3) target bundleno = 4 (0x4), region = 83 }
 0x22f   :  { %1470 = vsyncpa [#allocation4], 1 }
 0x230   :  { %1472 = vsyncpa [#allocation4 + $0x1], 1 }

</bundles_post_ra>
